<compile_context>
chip_gen: v7x
topology: tpu7x:2x2x1
jax: 0.10.0
libtpu: 0.0.40
codegen_flags: <defaults>
</compile_context>

<pallas_src>
import functools
from typing import NamedTuple

import jax
import jax.numpy as jnp
from jax.experimental import pallas as pl
from jax.experimental.pallas import tpu as pltpu


def _round_up(n, m):
    return ((n + m - 1) // m) * m


def _sublane_multiple(dtype):
    # Packed-sublane count per vreg tile: 8 for 4-byte, 16 for 2-byte, 32 for 1-byte.
    return {4: 8, 2: 16, 1: 32}.get(jnp.dtype(dtype).itemsize, 8)


def _prefers_small_row_tile():
    # v5e's MXU is 4x128x128: 128 rows already saturate it and 256 only doubles
    # the f32 h/accumulator intermediates. v6e/v7x (2x256x256) benefit from 256.
    try:
        kind = jax.devices()[0].device_kind.lower()
    except Exception:  # device query failure -> assume the larger-MXU default
        return False
    return ("v5 lite" in kind) or ("v5e" in kind)


def _choose_tile_m(m, dtype):
    sub = _sublane_multiple(dtype)
    if m < 128:
        return max(sub, _round_up(m, sub))          # tiny problem: one packed tile
    tm = 128 if (m < 512 or _prefers_small_row_tile()) else 256
    # Keep >= 2 row-grid steps so both v7x TensorCores get work on the
    # "parallel" row axis.
    while tm > sub and _round_up(m, tm) // tm < 2:
        tm //= 2
    return max(tm, sub)


def _buffer_bytes(tile_m, tile_k, Dv_p, Dl_p, x_dt, w_dt, o_dt):
    """Approximate VMEM footprint of the pipeline buffers + scratch."""
    xi, wi, oi = (jnp.dtype(d).itemsize for d in (x_dt, w_dt, o_dt))
    b = 0
    b += 2 * tile_m * Dv_p * xi              # x row tile (double-buffered)
    b += 2 * Dv_p * tile_k * wi              # w1 K-tile (double-buffered)
    b += 2 * tile_k * wi                     # b1 K-tile
    b += 2 * tile_k * Dl_p * wi              # w2 K-tile (double-buffered)
    b += 2 * 3 * Dl_p * wi + 2 * Dl_p * 4    # b2 / gamma / beta + f32 mask
    b += 2 * tile_m * Dl_p * oi              # output tile (double-buffered)
    b += tile_m * Dl_p * 4                   # f32 accumulator scratch
    b += tile_m * tile_k * 4                 # f32 ReLU tile (compiler temp)
    b += 2 * tile_m * Dl_p * 4               # LayerNorm temps (compiler)
    return b


def _pick_tiles(m, Dv_p, Dh_p, Dl_p, x_dt, w_dt, o_dt):
    tile_m = _choose_tile_m(m, x_dt)
    budget = 48 * 1024 * 1024   # leave headroom inside v7x's 64 MiB VMEM
    # tile_k must be a multiple of 128 (lane-dense) and divide Dh_p.
    candidates = [c for c in range(128, min(Dh_p, 512) + 1, 128) if Dh_p % c == 0]
    tile_k = candidates[0]
    for c in candidates:
        if _buffer_bytes(tile_m, c, Dv_p, Dl_p, x_dt, w_dt, o_dt) <= budget:
            tile_k = c
    sub = _sublane_multiple(x_dt)
    while (_buffer_bytes(tile_m, tile_k, Dv_p, Dl_p, x_dt, w_dt, o_dt) > budget
           and tile_m > sub):
        tile_m = max(sub, tile_m // 2)
    return tile_m, tile_k


class ProjectionParams(NamedTuple):
    w1: jax.Array      # (Dv_p, Dh_p)
    b1: jax.Array      # (1, Dh_p)
    w2: jax.Array      # (Dh_p, Dl_p)
    b2: jax.Array      # (1, Dl_p)
    gamma: jax.Array   # (1, Dl_p)
    beta: jax.Array    # (1, Dl_p)
    mask: jax.Array    # (1, Dl_p) f32, 1.0 on real output columns
    vision_dim: int
    language_dim: int


def prepare_params(w1, b1, w2, b2, gamma, beta):
    """Zero-pad parameters to lane-dense (multiple-of-128) feature dims ONCE.

    Done at init time, not per forward call, so every forward avoids full HBM
    read+write passes over the weights just to re-pad them.
    """
    Dv, Dh = w1.shape
    Dl = w2.shape[1]
    Dv_p, Dh_p, Dl_p = (_round_up(d, 128) for d in (Dv, Dh, Dl))
    w1_p = jnp.pad(w1, ((0, Dv_p - Dv), (0, Dh_p - Dh)))
    b1_p = jnp.pad(b1.reshape(1, Dh), ((0, 0), (0, Dh_p - Dh)))
    w2_p = jnp.pad(w2, ((0, Dh_p - Dh), (0, Dl_p - Dl)))
    b2_p = jnp.pad(b2.reshape(1, Dl), ((0, 0), (0, Dl_p - Dl)))
    gamma_p = jnp.pad(gamma.reshape(1, Dl), ((0, 0), (0, Dl_p - Dl)))
    beta_p = jnp.pad(beta.reshape(1, Dl), ((0, 0), (0, Dl_p - Dl)))
    mask = jnp.pad(jnp.ones((1, Dl), jnp.float32), ((0, 0), (0, Dl_p - Dl)))
    return ProjectionParams(w1_p, b1_p, w2_p, b2_p, gamma_p, beta_p, mask, Dv, Dl)


def _projection_kernel(x_ref, w1_ref, b1_ref, w2_ref, b2_ref,
                       gamma_ref, beta_ref, mask_ref, o_ref, acc_ref,
                       *, eps, inv_dl):
    # Grid: (row tiles, hidden-dim K tiles). Per step:
    #   x_ref:  (TM, Dv_p)   row tile (resident across k)
    #   w1_ref: (Dv_p, TK)   first-linear weight K-tile
    #   b1_ref: (1, TK)
    #   w2_ref: (TK, Dl_p)   second-linear weight K-tile
    #   b2/gamma/beta/mask:  (1, Dl_p) invariants
    #   o_ref:  (TM, Dl_p)   written only on the last k step
    #   acc_ref:(TM, Dl_p)   f32 accumulator scratch
    k = pl.program_id(1)

    @pl.when(k == 0)
    def _():
        acc_ref[...] = jnp.zeros_like(acc_ref)

    # Linear 1 over this hidden tile: native-dtype MXU operands, f32 accumulate.
    h = jnp.dot(x_ref[...], w1_ref[...], preferred_element_type=jnp.float32)
    h = jnp.maximum(h + b1_ref[...].astype(jnp.float32), 0.0)

    # Linear 2 partial product; cast only the small activation tile to the
    # weight dtype (never the weight tile). f32 accumulation in scratch.
    acc_ref[...] += jnp.dot(h.astype(w2_ref.dtype), w2_ref[...],
                            preferred_element_type=jnp.float32)

    @pl.when(k == pl.num_programs(1) - 1)
    def _():
        y = acc_ref[...] + b2_ref[...].astype(jnp.float32)
        # Padded feature columns of y are exactly zero (zero-padded w2/b2), so
        # summing over the padded width and dividing by the true width gives
        # the correct mean; the precomputed mask re-zeroes the padded columns
        # after centering so the variance is also exact.
        mean = jnp.sum(y, axis=-1, keepdims=True) * inv_dl
        centered = (y - mean) * mask_ref[...]
        var = jnp.sum(centered * centered, axis=-1, keepdims=True) * inv_dl
        y_norm = centered * jax.lax.rsqrt(var + eps)
        out = (y_norm * gamma_ref[...].astype(jnp.float32)
               + beta_ref[...].astype(jnp.float32))
        o_ref[...] = out.astype(o_ref.dtype)


def projection_layer(x, params: ProjectionParams, *, eps=1e-5):
    """Pallas implementation of ProjectionLayer.forward.

    x: (B, S, vision_dim) or (B, vision_dim) (the latter is unsqueezed to S=1,
    matching torch). Returns (B, S, language_dim).
    """
    if x.ndim == 2:
        x = x[:, None, :]                      # == torch unsqueeze(1)
    B, S, Dv = x.shape
    assert Dv == params.vision_dim, "input feature dim mismatch"
    Dv_p, Dh_p = params.w1.shape
    Dl_p = params.w2.shape[1]
    Dl = params.language_dim

    M = B * S
    x2d = x.reshape(M, Dv)

    tile_m, tile_k = _pick_tiles(M, Dv_p, Dh_p, Dl_p,
                                 x.dtype, params.w1.dtype, x.dtype)
    M_pad = _round_up(M, tile_m)
    if M_pad != M or Dv_p != Dv:
        x2d = jnp.pad(x2d, ((0, M_pad - M), (0, Dv_p - Dv)))

    grid = (M_pad // tile_m, Dh_p // tile_k)

    kernel = functools.partial(_projection_kernel, eps=eps, inv_dl=1.0 / Dl)

    # Advisory cost estimate for the XLA scheduler.
    flops = 2 * M_pad * (Dv_p * Dh_p + Dh_p * Dl_p)
    param_bytes = sum(int(a.size) * a.dtype.itemsize for a in
                      (params.w1, params.b1, params.w2, params.b2,
                       params.gamma, params.beta, params.mask))
    bytes_accessed = (int(x2d.size) * x2d.dtype.itemsize
                      + M_pad * Dl_p * jnp.dtype(x.dtype).itemsize
                      + param_bytes)
    cost = pl.CostEstimate(flops=int(flops), transcendentals=int(M_pad),
                           bytes_accessed=int(bytes_accessed))

    # Derived VMEM limit: real footprint + margin, capped at 56 MiB so it is
    # safe on v7x (64 MiB physical) while above the 16/32 MiB scoped defaults.
    footprint = _buffer_bytes(tile_m, tile_k, Dv_p, Dl_p,
                              x.dtype, params.w1.dtype, x.dtype)
    vmem_limit = int(min(56 * 1024 * 1024,
                         max(32 * 1024 * 1024, footprint * 5 // 4 + (4 << 20))))

    # Invariant (1, Dl_p) vectors: constant index_map so they are fetched once.
    # Left on the default pipeline (a few KiB) — no capability-dependent
    # pipeline_mode path and no silent fallback.
    def const_spec():
        return pl.BlockSpec((1, Dl_p), lambda i, k: (0, 0))

    out2d = pl.pallas_call(
        kernel,
        out_shape=jax.ShapeDtypeStruct((M_pad, Dl_p), x.dtype),
        grid_spec=pltpu.PrefetchScalarGridSpec(
            num_scalar_prefetch=0,
            grid=grid,
            in_specs=[
                pl.BlockSpec((tile_m, Dv_p), lambda i, k: (i, 0)),   # x (resident over k)
                pl.BlockSpec((Dv_p, tile_k), lambda i, k: (0, k)),   # w1 K-tile
                pl.BlockSpec((1, tile_k),    lambda i, k: (0, k)),   # b1 K-tile
                pl.BlockSpec((tile_k, Dl_p), lambda i, k: (k, 0)),   # w2 K-tile
                const_spec(),                                        # b2
                const_spec(),                                        # gamma
                const_spec(),                                        # beta
                const_spec(),                                        # mask (f32)
            ],
            out_specs=pl.BlockSpec((tile_m, Dl_p), lambda i, k: (i, 0)),
            scratch_shapes=[pltpu.VMEM((tile_m, Dl_p), jnp.float32)],
        ),
        compiler_params=pltpu.CompilerParams(
            dimension_semantics=("parallel", "arbitrary"),
            vmem_limit_bytes=vmem_limit),
        cost_estimate=cost,
    )(x2d, params.w1, params.b1, params.w2, params.b2,
      params.gamma, params.beta, params.mask)

    return out2d[:M, :Dl].reshape(B, S, Dl)


def init_params(key, vision_dim, language_dim, dtype=jnp.float32):
    """Deterministic init mimicking PyTorch defaults (uniform +/- 1/sqrt(fan_in))."""
    hidden = language_dim * 2
    k1, k2, k3, k4 = jax.random.split(key, 4)
    bound1 = 1.0 / (vision_dim ** 0.5)
    bound2 = 1.0 / (hidden ** 0.5)
    w1 = jax.random.uniform(k1, (vision_dim, hidden), dtype, -bound1, bound1)
    b1 = jax.random.uniform(k2, (hidden,), dtype, -bound1, bound1)
    w2 = jax.random.uniform(k3, (hidden, language_dim), dtype, -bound2, bound2)
    b2 = jax.random.uniform(k4, (language_dim,), dtype, -bound2, bound2)
    gamma = jnp.ones((language_dim,), dtype)
    beta = jnp.zeros((language_dim,), dtype)
    return w1, b1, w2, b2, gamma, beta


def _reference(x, w1, b1, w2, b2, gamma, beta, eps=1e-5):
    if x.ndim == 2:
        x = x[:, None, :]
    x = x.astype(jnp.float32)
    h = jnp.maximum(x @ w1.astype(jnp.float32) + b1.astype(jnp.float32), 0.0)
    y = h @ w2.astype(jnp.float32) + b2.astype(jnp.float32)
    mean = jnp.mean(y, axis=-1, keepdims=True)
    var = jnp.mean((y - mean) ** 2, axis=-1, keepdims=True)
    return ((y - mean) * jax.lax.rsqrt(var + eps) * gamma.astype(jnp.float32)
            + beta.astype(jnp.float32))


if __name__ == "__main__":
    vision_dim = 32
    language_dim = 32
    batch, seq = 2, 8

    key = jax.random.PRNGKey(0)
    kx, kp = jax.random.split(key)
    x = jax.random.normal(kx, (batch, seq, vision_dim), jnp.float32)
    raw = init_params(kp, vision_dim, language_dim)
    params = prepare_params(*raw)          # pad once at init, not per forward

    out = jax.block_until_ready(projection_layer(x, params))
    ref = _reference(x, *raw)
    assert out.shape == (batch, seq, language_dim)
    assert jnp.allclose(out, ref, atol=1e-5, rtol=1e-5), "f32 mismatch vs reference"

    # 2-D input path (unsqueeze(1) semantics).
    x2 = jax.random.normal(kx, (batch, vision_dim), jnp.float32)
    out2 = jax.block_until_ready(projection_layer(x2, params))
    assert out2.shape == (batch, 1, language_dim)
    assert jnp.allclose(out2, _reference(x2, *raw), atol=1e-5, rtol=1e-5)

    # Native bf16 matmul path (no in-kernel weight casts); looser tolerance
    # since the ReLU tile is cast to bf16 for the second matmul by design.
    raw_bf16 = tuple(p.astype(jnp.bfloat16) for p in raw)
    params_bf16 = prepare_params(*raw_bf16)
    x_bf16 = x.astype(jnp.bfloat16)
    out_bf16 = jax.block_until_ready(projection_layer(x_bf16, params_bf16))
    ref_bf16 = _reference(x_bf16, *raw_bf16)
    assert out_bf16.shape == (batch, seq, language_dim)
    assert jnp.allclose(out_bf16.astype(jnp.float32), ref_bf16,
                        atol=5e-2, rtol=5e-2), "bf16 mismatch vs reference"

    print("KERNEL_OK")
</pallas_src>

<mosaic_0001>
module attributes {stable_mosaic.version = 11 : i64} {
  func.func @_projection_kernel(%arg0: i32, %arg1: i32, %arg2: memref<16x128xf32, #tpu.memory_space<vmem>>, %arg3: memref<128x128xf32, #tpu.memory_space<vmem>>, %arg4: memref<1x128xf32, #tpu.memory_space<vmem>>, %arg5: memref<128x128xf32, #tpu.memory_space<vmem>>, %arg6: memref<1x128xf32, #tpu.memory_space<vmem>>, %arg7: memref<1x128xf32, #tpu.memory_space<vmem>>, %arg8: memref<1x128xf32, #tpu.memory_space<vmem>>, %arg9: memref<1x128xf32, #tpu.memory_space<vmem>>, %arg10: memref<16x128xf32, #tpu.memory_space<vmem>>, %arg11: memref<16x128xf32, #tpu.memory_space<vmem>>) attributes {dimension_semantics = [#tpu.dimension_semantics<parallel>, #tpu.dimension_semantics<arbitrary>], iteration_bounds = array<i64: 1, 1>, scalar_prefetch = 0 : i64, scratch_operands = 1 : i64, tpu.core_type = #tpu.core_type<tc>, window_params = [{transform_indices = @transform_0, window_bounds = array<i64: 16, 128>}, {transform_indices = @transform_1, window_bounds = array<i64: 128, 128>}, {transform_indices = @transform_2, window_bounds = array<i64: 1, 128>}, {transform_indices = @transform_3, window_bounds = array<i64: 128, 128>}, {pipeline_mode = #tpu.pipeline_mode<synchronous>, transform_indices = @transform_4, window_bounds = array<i64: 1, 128>}, {pipeline_mode = #tpu.pipeline_mode<synchronous>, transform_indices = @transform_5, window_bounds = array<i64: 1, 128>}, {pipeline_mode = #tpu.pipeline_mode<synchronous>, transform_indices = @transform_6, window_bounds = array<i64: 1, 128>}, {pipeline_mode = #tpu.pipeline_mode<synchronous>, transform_indices = @transform_7, window_bounds = array<i64: 1, 128>}, {transform_indices = @transform_8, window_bounds = array<i64: 16, 128>}]} {
    %c0_i32 = arith.constant 0 : i32
    %0 = arith.cmpi eq, %arg1, %c0_i32 : i32
    %1 = arith.extui %0 : i1 to i32
    %c0_i32_0 = arith.constant 0 : i32
    %2 = arith.cmpi ne, %1, %c0_i32_0 : i32
    scf.if %2 {
      %cst_16 = arith.constant 0.000000e+00 : f32
      %19 = vector.broadcast %cst_16 : f32 to vector<16x128xf32>
      %c0_17 = arith.constant 0 : index
      %c0_18 = arith.constant 0 : index
      %20 = vector.load %arg11[%c0_17, %c0_18] : memref<16x128xf32, #tpu.memory_space<vmem>>, vector<16x128xf32>
      tpu.vector_store %arg11[%c0_17, %c0_18], %19 {strides = array<i32>} : memref<16x128xf32, #tpu.memory_space<vmem>>, vector<16x128xf32>,
    } else {
    }
    %c0 = arith.constant 0 : index
    %c0_1 = arith.constant 0 : index
    %3 = vector.load %arg2[%c0, %c0_1] : memref<16x128xf32, #tpu.memory_space<vmem>>, vector<16x128xf32>
    %c0_2 = arith.constant 0 : index
    %c0_3 = arith.constant 0 : index
    %4 = vector.load %arg3[%c0_2, %c0_3] : memref<128x128xf32, #tpu.memory_space<vmem>>, vector<128x128xf32>
    %cst = arith.constant dense<0.000000e+00> : vector<16x128xf32>
    %5 = tpu.matmul %3, %4, %cst {dimension_numbers = #tpu.dot_dimension_numbers<[1], [0], [0], [1], [0, 0, 1, 1], [], []>} : vector<16x128xf32>, vector<128x128xf32>, vector<16x128xf32> -> vector<16x128xf32>
    %c0_4 = arith.constant 0 : index
    %c0_5 = arith.constant 0 : index
    %6 = vector.load %arg4[%c0_4, %c0_5] : memref<1x128xf32, #tpu.memory_space<vmem>>, vector<1x128xf32>
    %7 = vector.broadcast %6 : vector<1x128xf32> to vector<16x128xf32>
    %8 = arith.addf %5, %7 : vector<16x128xf32>
    %cst_6 = arith.constant 0.000000e+00 : f32
    %9 = vector.broadcast %cst_6 : f32 to vector<16x128xf32>
    %10 = arith.maximumf %8, %9 : vector<16x128xf32>
    %c0_7 = arith.constant 0 : index
    %c0_8 = arith.constant 0 : index
    %11 = vector.load %arg11[%c0_7, %c0_8] : memref<16x128xf32, #tpu.memory_space<vmem>>, vector<16x128xf32>
    %c0_9 = arith.constant 0 : index
    %c0_10 = arith.constant 0 : index
    %12 = vector.load %arg5[%c0_9, %c0_10] : memref<128x128xf32, #tpu.memory_space<vmem>>, vector<128x128xf32>
    %cst_11 = arith.constant dense<0.000000e+00> : vector<16x128xf32>
    %13 = tpu.matmul %10, %12, %cst_11 {dimension_numbers = #tpu.dot_dimension_numbers<[1], [0], [0], [1], [0, 0, 1, 1], [], []>} : vector<16x128xf32>, vector<128x128xf32>, vector<16x128xf32> -> vector<16x128xf32>
    %14 = arith.addf %11, %13 : vector<16x128xf32>
    %c0_12 = arith.constant 0 : index
    %c0_13 = arith.constant 0 : index
    %15 = vector.load %arg11[%c0_12, %c0_13] : memref<16x128xf32, #tpu.memory_space<vmem>>, vector<16x128xf32>
    tpu.vector_store %arg11[%c0_12, %c0_13], %14 {strides = array<i32>} : memref<16x128xf32, #tpu.memory_space<vmem>>, vector<16x128xf32>,
    %c0_i32_14 = arith.constant 0 : i32
    %16 = arith.cmpi eq, %arg1, %c0_i32_14 : i32
    %17 = arith.extui %16 : i1 to i32
    %c0_i32_15 = arith.constant 0 : i32
    %18 = arith.cmpi ne, %17, %c0_i32_15 : i32
    scf.if %18 {
      %c0_16 = arith.constant 0 : index
      %c0_17 = arith.constant 0 : index
      %19 = vector.load %arg11[%c0_16, %c0_17] : memref<16x128xf32, #tpu.memory_space<vmem>>, vector<16x128xf32>
      %c0_18 = arith.constant 0 : index
      %c0_19 = arith.constant 0 : index
      %20 = vector.load %arg6[%c0_18, %c0_19] : memref<1x128xf32, #tpu.memory_space<vmem>>, vector<1x128xf32>
      %21 = vector.broadcast %20 : vector<1x128xf32> to vector<16x128xf32>
      %22 = arith.addf %19, %21 : vector<16x128xf32>
      %cst_20 = arith.constant dense<0.000000e+00> : vector<16xf32>
      %23 = vector.multi_reduction <add>, %22, %cst_20 [1] : vector<16x128xf32> to vector<16xf32>
      %24 = vector.shape_cast %23 : vector<16xf32> to vector<16x1xf32>
      %cst_21 = arith.constant 3.125000e-02 : f32
      %25 = vector.broadcast %cst_21 : f32 to vector<16x1xf32>
      %26 = arith.mulf %24, %25 : vector<16x1xf32>
      %27 = vector.broadcast %26 : vector<16x1xf32> to vector<16x128xf32>
      %28 = arith.subf %22, %27 : vector<16x128xf32>
      %c0_22 = arith.constant 0 : index
      %c0_23 = arith.constant 0 : index
      %29 = vector.load %arg9[%c0_22, %c0_23] : memref<1x128xf32, #tpu.memory_space<vmem>>, vector<1x128xf32>
      %30 = vector.broadcast %29 : vector<1x128xf32> to vector<16x128xf32>
      %31 = arith.mulf %28, %30 : vector<16x128xf32>
      %32 = arith.mulf %31, %31 : vector<16x128xf32>
      %cst_24 = arith.constant dense<0.000000e+00> : vector<16xf32>
      %33 = vector.multi_reduction <add>, %32, %cst_24 [1] : vector<16x128xf32> to vector<16xf32>
      %34 = vector.shape_cast %33 : vector<16xf32> to vector<16x1xf32>
      %cst_25 = arith.constant 3.125000e-02 : f32
      %35 = vector.broadcast %cst_25 : f32 to vector<16x1xf32>
      %36 = arith.mulf %34, %35 : vector<16x1xf32>
      %cst_26 = arith.constant 9.99999974E-6 : f32
      %37 = vector.broadcast %cst_26 : f32 to vector<16x1xf32>
      %38 = arith.addf %36, %37 : vector<16x1xf32>
      %39 = math.rsqrt %38 : vector<16x1xf32>
      %40 = vector.broadcast %39 : vector<16x1xf32> to vector<16x128xf32>
      %41 = arith.mulf %31, %40 : vector<16x128xf32>
      %c0_27 = arith.constant 0 : index
      %c0_28 = arith.constant 0 : index
      %42 = vector.load %arg7[%c0_27, %c0_28] : memref<1x128xf32, #tpu.memory_space<vmem>>, vector<1x128xf32>
      %43 = vector.broadcast %42 : vector<1x128xf32> to vector<16x128xf32>
      %44 = arith.mulf %41, %43 : vector<16x128xf32>
      %c0_29 = arith.constant 0 : index
      %c0_30 = arith.constant 0 : index
      %45 = vector.load %arg8[%c0_29, %c0_30] : memref<1x128xf32, #tpu.memory_space<vmem>>, vector<1x128xf32>
      %46 = vector.broadcast %45 : vector<1x128xf32> to vector<16x128xf32>
      %47 = arith.addf %44, %46 : vector<16x128xf32>
      %c0_31 = arith.constant 0 : index
      %c0_32 = arith.constant 0 : index
      %48 = vector.load %arg10[%c0_31, %c0_32] : memref<16x128xf32, #tpu.memory_space<vmem>>, vector<16x128xf32>
      tpu.vector_store %arg10[%c0_31, %c0_32], %47 {strides = array<i32>} : memref<16x128xf32, #tpu.memory_space<vmem>>, vector<16x128xf32>,
    } else {
    }
    return
  }
  func.func @transform_0(%arg0: i32, %arg1: i32) -> (i32, i32) {
    %c0_i32 = arith.constant 0 : i32
    %c0_i32_0 = arith.constant 0 : i32
    return %arg0, %c0_i32 : i32, i32
  }
  func.func @transform_1(%arg0: i32, %arg1: i32) -> (i32, i32) {
    %c0_i32 = arith.constant 0 : i32
    %c0_i32_0 = arith.constant 0 : i32
    return %c0_i32, %arg1 : i32, i32
  }
  func.func @transform_2(%arg0: i32, %arg1: i32) -> (i32, i32) {
    %c0_i32 = arith.constant 0 : i32
    %c0_i32_0 = arith.constant 0 : i32
    return %c0_i32, %arg1 : i32, i32
  }
  func.func @transform_3(%arg0: i32, %arg1: i32) -> (i32, i32) {
    %c0_i32 = arith.constant 0 : i32
    %c0_i32_0 = arith.constant 0 : i32
    return %arg1, %c0_i32 : i32, i32
  }
  func.func @transform_4(%arg0: i32, %arg1: i32) -> (i32, i32) {
    %c0_i32 = arith.constant 0 : i32
    %c0_i32_0 = arith.constant 0 : i32
    %c0_i32_1 = arith.constant 0 : i32
    return %c0_i32, %c0_i32_0 : i32, i32
  }
  func.func @transform_5(%arg0: i32, %arg1: i32) -> (i32, i32) {
    %c0_i32 = arith.constant 0 : i32
    %c0_i32_0 = arith.constant 0 : i32
    %c0_i32_1 = arith.constant 0 : i32
    return %c0_i32, %c0_i32_0 : i32, i32
  }
  func.func @transform_6(%arg0: i32, %arg1: i32) -> (i32, i32) {
    %c0_i32 = arith.constant 0 : i32
    %c0_i32_0 = arith.constant 0 : i32
    %c0_i32_1 = arith.constant 0 : i32
    return %c0_i32, %c0_i32_0 : i32, i32
  }
  func.func @transform_7(%arg0: i32, %arg1: i32) -> (i32, i32) {
    %c0_i32 = arith.constant 0 : i32
    %c0_i32_0 = arith.constant 0 : i32
    %c0_i32_1 = arith.constant 0 : i32
    return %c0_i32, %c0_i32_0 : i32, i32
  }
  func.func @transform_8(%arg0: i32, %arg1: i32) -> (i32, i32) {
    %c0_i32 = arith.constant 0 : i32
    %c0_i32_0 = arith.constant 0 : i32
    return %arg0, %c0_i32 : i32, i32
  }
}

</mosaic_0001>

<bundles_post_ra>
// kernel: tpu_custom_call.1
= control target key start
LH: loop header
LB: loop body
LE: loop exit
PB: predicated region body
PF: predicated region fallthrough
CT: control target
= control target key end

     0   :  { %13 = vsyncpa [#allocation4], 0  ;;  %s771_s0 = inlined_call_operand.hbm [shape: f32[16,128], index: 0, kind: input, shape index: {}]   ;;  %s772_s1 = inlined_call_operand.hbm [shape: f32[128,128], index: 1, kind: input, shape index: {}]   ;;  %s773_s2 = inlined_call_operand.vmem [shape: f32[1,128], index: 2, kind: input, shape index: {}]   ;;  %s774_s3 = inlined_call_operand.hbm [shape: f32[128,128], index: 3, kind: input, shape index: {}]   ;;  %s775_s4 = inlined_call_operand.vmem [shape: f32[1,128], index: 4, kind: input, shape index: {}]   ;;  %s776_s5 = inlined_call_operand.vmem [shape: f32[1,128], index: 5, kind: input, shape index: {}]   ;;  %s777_s6 = inlined_call_operand.vmem [shape: f32[1,128], index: 6, kind: input, shape index: {}]   ;;  %s778_s7 = inlined_call_operand.vmem [shape: f32[1,128], index: 7, kind: input, shape index: {}]   ;;  %s779_s8 = inlined_call_operand.hbm [shape: f32[16,128], index: 8, kind: output, shape index: {}]  }
   0x1   :  { %14 = vsyncpa [#allocation7], 0 }
   0x2   :  { %15 = vsyncpa [#allocation5], 0  ;;  %s638_s27 = smov [#allocation6]   ;;  %s639_s29 = smov [#allocation3]  }
   0x3   :  { %s33_s28 = sshll.u32 %s638_s27, 4  ;;  %s21_s30 = sshll.u32 %s639_s29, 4  ;;  %s34_s28 = int_to_ptr.vmem [resolvable:$true] %s33_s28  ;;  %s689_s30 = int_to_ptr.vmem [resolvable:$true] %s21_s30 }
   0x4   :  { %s544_s11 = scalar_lea.hbm %s772_s1, 2048 }
   0x5   :  { %p545_p0 = scmp.ne.s32.totalorder %s772_s1, %s544_s11  ;;  %p548_p1 = scmp.lt.u32.totalorder %s544_s11, %s772_s1 }
   0x7   :  { %p550_p2 = pnand %p548_p1, %p545_p0 }
   0x9   :  { %553 = shalt.err (!%p550_p2)
}
   0xa   :  { %s554_s16 = scalar_lea.vmem %s34_s28, 2048  ;;  %p559_p4 = scmp.lt.s32.totalorder %s34_s28, %s34_s28 }
   0xb   :  { %p555_p3 = scmp.ne.s32.totalorder %s34_s28, %s554_s16  ;;  %p560_p5 = scmp.lt.s32.totalorder %s554_s16, %s554_s16 }
   0xd   :  { %p561_p6 = por %p560_p5, %p559_p4 }
   0xf   :  { %p562_p7 = pnand %p561_p6, %p555_p3 }
  0x11   :  { %565 = shalt.err (!%p562_p7)
}
  0x12   :  { %s640_s17 = smov 128   ;;  %s641_s18 = smov 8  }
  0x13   :  { %39 = dma.hbm_to_vmem [thread:$0]  %s772_s1, 2048, %s34_s28, [#allocation7], %s640_s17, %s640_s17, %s641_s18  }
  0x14   :  { %s566_s23 = scalar_lea.hbm %s771_s0, 256 }
  0x15   :  { %p567_p8 = scmp.ne.s32.totalorder %s771_s0, %s566_s23  ;;  %p570_p9 = scmp.lt.u32.totalorder %s566_s23, %s771_s0 }
  0x17   :  { %p572_p10 = pnand %p570_p9, %p567_p8 }
  0x19   :  { %575 = shalt.err (!%p572_p10)
}
  0x1a   :  { %s576_s29 = scalar_lea.vmem %s689_s30, 256  ;;  %p581_p12 = scmp.lt.s32.totalorder %s689_s30, %s689_s30 }
  0x1b   :  { %p577_p11 = scmp.ne.s32.totalorder %s689_s30, %s576_s29  ;;  %p582_p13 = scmp.lt.s32.totalorder %s576_s29, %s576_s29 }
  0x1d   :  { %p583_p0 = por %p582_p13, %p581_p12 }
  0x1f   :  { %p584_p1 = pnand %p583_p0, %p577_p11 }
  0x21   :  { %587 = shalt.err (!%p584_p1)
}
  0x22   :  { %27 = dma.hbm_to_vmem [thread:$0]  %s771_s0, 256, %s689_s30, [#allocation4], %s640_s17, %s640_s17, %s641_s18  }
  0x23   :  { %s642_s9 = smov [#allocation8]   ;;  %s588_s13 = scalar_lea.hbm %s774_s3, 2048 }
  0x24   :  { %s47_s10 = sshll.u32 %s642_s9, 4  ;;  %p589_p2 = scmp.ne.s32.totalorder %s774_s3, %s588_s13  ;;  %s48_s10 = int_to_ptr.vmem [resolvable:$true] %s47_s10 }
  0x25   :  { %p592_p3 = scmp.lt.u32.totalorder %s588_s13, %s774_s3 }
  0x27   :  { %p594_p4 = pnand %p592_p3, %p589_p2 }
  0x29   :  { %597 = shalt.err (!%p594_p4)
}
  0x2a   :  { %s598_s20 = scalar_lea.vmem %s48_s10, 2048  ;;  %p603_p6 = scmp.lt.s32.totalorder %s48_s10, %s48_s10 }
  0x2b   :  { %p599_p5 = scmp.ne.s32.totalorder %s48_s10, %s598_s20  ;;  %p604_p7 = scmp.lt.s32.totalorder %s598_s20, %s598_s20 }
  0x2d   :  { %p605_p8 = por %p604_p7, %p603_p6 }
  0x2f   :  { %p606_p9 = pnand %p605_p8, %p599_p5 }
  0x31   :  { %609 = shalt.err (!%p606_p9)
}
  0x32   :  { %53 = dma.hbm_to_vmem [thread:$0]  %s774_s3, 2048, %s48_s10, [#allocation7], %s640_s17, %s640_s17, %s641_s18  }
  0x33   :  { %632 = dma.done.wait [#allocation4], 256  }
  0x34   :  { %633 = vsyncadd [#allocation4], 4294967040 }
  0x35   :  { %634 = dma.done.wait [#allocation7], 4096  }
  0x36   :  { %635 = vsyncadd [#allocation7], 4294963200  ;;  %v79_v0 = vld [vmem:[#allocation6] sm:$0xff]  ;;  %v80_v1 = vld [vmem:[#allocation6 + $0x8] sm:$0xff]  ;;  %s643_s27 = smov [#allocation9]  }
  0x37   :  { %v81_v2 = vld [vmem:[#allocation6 + $0x10] sm:$0xff]  ;;  %v470_v3 = vpack.c.bf16 %v80_v1, %v79_v0  ;;  %v82_v4 = vld [vmem:[#allocation6 + $0x18] sm:$0xff]  ;;  %v83_v6 = vld [vmem:[#allocation6 + $0x20] sm:$0xff]  ;;  %s346_s29 = sshll.u32 %s643_s27, 4  ;;  %s347_s29 = int_to_ptr.vmem [resolvable:$true] %s346_s29 }
  0x38   :  { %v474_v5 = vpack.c.bf16 %v82_v4, %v81_v2  ;;  %v84_v7 = vld [vmem:[#allocation6 + $0x28] sm:$0xff]  ;;  %v85_v9 = vld [vmem:[#allocation6 + $0x30] sm:$0xff]  ;;  %v86_v10 = vld [vmem:[#allocation6 + $0x38] sm:$0xff]  ;;  %s610_s1 = scalar_lea.vmem %s347_s29, 256  ;;  %p615_p11 = scmp.lt.s32.totalorder %s347_s29, %s347_s29 }
  0x39   :  { %471 = vmatprep.subr.bf16.mxu0 %v470_v3  ;;  %v478_v8 = vpack.c.bf16 %v84_v7, %v83_v6  ;;  %v77_v11 = vld [vmem:[#allocation3] sm:$0xff]  ;;  %v181_v12 = vld [vmem:[#allocation8] sm:$0xff]  ;;  %v182_v13 = vld [vmem:[#allocation8 + $0x8] sm:$0xff]  ;;  %v482_v20 = vpack.c.bf16 %v86_v10, %v85_v9  ;;  %p611_p10 = scmp.ne.s32.totalorder %s347_s29, %s610_s1  ;;  %p616_p12 = scmp.lt.s32.totalorder %s610_s1, %s610_s1 }
  0x3a   :  { %473 = vmatpush3.bf16.msra.mxu0 %v470_v3  ;;  %432 = vmatprep.mubr.f32.mxu0 %v77_v11  ;;  %v183_v14 = vld [vmem:[#allocation8 + $0x10] sm:$0xff]  ;;  %v502_v15 = vpack.c.bf16 %v182_v13, %v181_v12  ;;  %v184_v16 = vld [vmem:[#allocation8 + $0x18] sm:$0xff]  ;;  %v185_v18 = vld [vmem:[#allocation8 + $0x20] sm:$0xff] }
  0x3b   :  { %475 = vmatprep.subr.bf16.mxu0 %v474_v5  ;;  %v506_v17 = vpack.c.bf16 %v184_v16, %v183_v14  ;;  %v186_v19 = vld [vmem:[#allocation8 + $0x28] sm:$0xff]  ;;  %v87_v21 = vld [vmem:[#allocation6 + $0x40] sm:$0xff]  ;;  %v187_v24 = vld [vmem:[#allocation8 + $0x30] sm:$0xff]  ;;  %p617_p13 = por %p616_p12, %p615_p11 }
  0x3c   :  { %503 = vmatprep.subr.bf16.mxu1 %v502_v15  ;;  %v88_v22 = vld [vmem:[#allocation6 + $0x48] sm:$0xff]  ;;  %v510_v23 = vpack.c.bf16 %v186_v19, %v185_v18  ;;  %v188_v25 = vld [vmem:[#allocation8 + $0x38] sm:$0xff]  ;;  %v89_v27 = vld [vmem:[#allocation6 + $0x50] sm:$0xff] }
  0x3d   :  { %505 = vmatpush3.bf16.msra.mxu1 %v502_v15  ;;  %v486_v26 = vpack.c.bf16 %v88_v22, %v87_v21  ;;  %v90_v28 = vld [vmem:[#allocation6 + $0x58] sm:$0xff]  ;;  %v514_v29 = vpack.c.bf16 %v188_v25, %v187_v24  ;;  %v189_v30 = vld [vmem:[#allocation8 + $0x40] sm:$0xff]  ;;  %v190_v31 = vld [vmem:[#allocation8 + $0x48] sm:$0xff]  ;;  %p618_p0 = pnand %p617_p13, %p611_p10 }
  0x3e   :  { %477 = vmatpush3.bf16.msra.mxu0 %v474_v5  ;;  %507 = vmatprep.subr.bf16.mxu1 %v506_v17  ;;  %v490_v32 = vpack.c.bf16 %v90_v28, %v89_v27  ;;  %v91_v33 = vld [vmem:[#allocation6 + $0x60] sm:$0xff]  ;;  %v92_v34 = vld [vmem:[#allocation6 + $0x68] sm:$0xff]  ;;  %v518_v35 = vpack.c.bf16 %v190_v31, %v189_v30  ;;  %v191_v36 = vld [vmem:[#allocation8 + $0x50] sm:$0xff] }
  0x3f   :  { %479 = vmatprep.subr.bf16.mxu0 %v478_v8  ;;  %v192_v37 = vld [vmem:[#allocation8 + $0x58] sm:$0xff]  ;;  %v494_v38 = vpack.c.bf16 %v92_v34, %v91_v33  ;;  %v93_v39 = vld [vmem:[#allocation6 + $0x70] sm:$0xff]  ;;  %v193_v42 = vld [vmem:[#allocation8 + $0x60] sm:$0xff] }
  0x40   :  { %v94_v40 = vld [vmem:[#allocation6 + $0x78] sm:$0xff]  ;;  %v522_v41 = vpack.c.bf16 %v192_v37, %v191_v36  ;;  %v194_v43 = vld [vmem:[#allocation8 + $0x68] sm:$0xff]  ;;  %v195_v47 = vld [vmem:[#allocation8 + $0x70] sm:$0xff] }
  0x41   :  { %509 = vmatpush3.bf16.msra.mxu1 %v506_v17  ;;  %v498_v44 = vpack.c.bf16 %v94_v40, %v93_v39  ;;  %v526_v45 = vpack.c.bf16 %v194_v43, %v193_v42  ;;  %v78_v46 = vld [vmem:[#allocation3 + $0x8] sm:$0xff]  ;;  %v359_v50 = vld [vmem:[%s773_s2] ss:$0 sm:$0xff] }
  0x42   :  { %481 = vmatpush3.bf16.msra.mxu0 %v478_v8  ;;  %511 = vmatprep.subr.bf16.mxu1 %v510_v23  ;;  %v196_v48 = vld [vmem:[#allocation8 + $0x78] sm:$0xff]  ;;  %v360_v57 = vld [vmem:[%s775_s4] ss:$0 sm:$0xff] }
  0x43   :  { %483 = vmatprep.subr.bf16.mxu0 %v482_v20  ;;  %v530_v49 = vpack.c.bf16 %v196_v48, %v195_v47  ;;  %v361_v0 = vld [vmem:[%s778_s7] ss:$0 sm:$0xff] }
  0x44   :  { %v362_v16 = vld [vmem:[%s776_s5] ss:$0 sm:$0xff] }
  0x45   :  { %513 = vmatpush3.bf16.msra.mxu1 %v510_v23  ;;  %v363_v18 = vld [vmem:[%s777_s6] ss:$0 sm:$0xff] }
  0x46   :  { %485 = vmatpush3.bf16.msra.mxu0 %v482_v20  ;;  %515 = vmatprep.subr.bf16.mxu1 %v514_v29 }
  0x47   :  { %487 = vmatprep.subr.bf16.mxu0 %v486_v26 }
  0x49   :  { %517 = vmatpush3.bf16.msra.mxu1 %v514_v29 }
  0x4a   :  { %489 = vmatpush3.bf16.msra.mxu0 %v486_v26  ;;  %519 = vmatprep.subr.bf16.mxu1 %v518_v35 }
  0x4b   :  { %491 = vmatprep.subr.bf16.mxu0 %v490_v32 }
  0x4d   :  { %521 = vmatpush3.bf16.msra.mxu1 %v518_v35 }
  0x4e   :  { %493 = vmatpush3.bf16.msra.mxu0 %v490_v32  ;;  %523 = vmatprep.subr.bf16.mxu1 %v522_v41 }
  0x4f   :  { %495 = vmatprep.subr.bf16.mxu0 %v494_v38 }
  0x51   :  { %525 = vmatpush3.bf16.msra.mxu1 %v522_v41 }
  0x52   :  { %497 = vmatpush3.bf16.msra.mxu0 %v494_v38  ;;  %527 = vmatprep.subr.bf16.mxu1 %v526_v45 }
  0x53   :  { %499 = vmatprep.subr.bf16.mxu0 %v498_v44 }
  0x55   :  { %529 = vmatpush3.bf16.msra.mxu1 %v526_v45 }
  0x56   :  { %501 = vmatpush3.bf16.msra.mxu0 %v498_v44  ;;  %531 = vmatprep.subr.bf16.mxu1 %v530_v49 }
  0x59   :  { %433 = vmatmul.mubr.f32.vlgmr.msra.gmra.mrb[0].mxu0 %v78_v46  ;;  %533 = vmatpush3.bf16.msra.mxu1 %v530_v49 }
 0x12c   :  { %v434_v51 = vpop.f32.mrb[0].mxu0 }
 0x12d   :  { %v174_v52 = vadd.f32 %v434_v51, %v359_v50  ;;  %v168_v53 = vpop.f32.mrb[1].mxu0 }
 0x12e   :  { %v169_v54 = vadd.f32 %v359_v50, %v168_v53 }
 0x12f   :  { %v178_v56 = vmax.f32 %v174_v52, 0.0 }
 0x130   :  { %v177_v55 = vmax.f32 %v169_v54, 0.0 }
 0x132   :  { %467 = vmatprep.mubr.f32.mxu1 %v177_v55 }
 0x133   :  { %468 = vmatmul.mubr.f32.vlgmr.msra.gmra.mrb[0].mxu1 %v178_v56 }
 0x206   :  { %v469_v58 = vpop.f32.mrb[0].mxu1 }
 0x207   :  { %v263_v59 = vpop.f32.mrb[1].mxu1  ;;  %v289_v61 = vadd.f32 %v469_v58, %v360_v57 }
 0x208   :  { %v288_v60 = vadd.f32 %v360_v57, %v263_v59 }
 0x20a   :  { %290 = vadd.xlane.f32.xlu0 %v288_v60 }
 0x20e   :  { %292 = vadd.xlane.f32.xlu0 %v289_v61 }
 0x297   :  { %v291_v62 = vpop.xlane.xlu0 %290 }
 0x298   :  { %v294_v63 = vmul.f32 0.03125, %v291_v62 }
 0x29a   :  { %v296_v1 = vsub.f32 %v288_v60, %v294_v63 }
 0x29b   :  { %v293_v2 = vpop.xlane.xlu0 %292 }
 0x29c   :  { %v295_v3 = vmul.f32 0.03125, %v293_v2  ;;  %v305_v4 = vmul.f32 %v361_v0, %v296_v1 }
 0x29e   :  { %v297_v5 = vsub.f32 %v289_v61, %v295_v3  ;;  %v307_v6 = vmul.f32 %v305_v4, %v305_v4 }
 0x2a0   :  { %309 = vadd.xlane.f32.xlu1 %v307_v6  ;;  %v306_v7 = vmul.f32 %v361_v0, %v297_v5 }
 0x2a2   :  { %v308_v8 = vmul.f32 %v306_v7, %v306_v7 }
 0x2a4   :  { %311 = vadd.xlane.f32.xlu1 %v308_v8 }
 0x32d   :  { %v310_v9 = vpop.xlane.xlu1 %309 }
 0x32e   :  { %v313_v10 = vmul.f32 0.03125, %v310_v9 }
 0x330   :  { %v315_v11 = vadd.f32 1e-05, %v313_v10 }
 0x331   :  { %v312_v12 = vpop.xlane.xlu1 %311 }
 0x332   :  { %540 = vrsqrt.f32 %v315_v11  ;;  %v314_v13 = vmul.f32 0.03125, %v312_v12 }
 0x334   :  { %v316_v14 = vadd.f32 1e-05, %v314_v13 }
 0x336   :  { %542 = vrsqrt.f32 %v316_v14 }
 0x33c   :  { %v541_v15 = vpop.eup %540 }
 0x33d   :  { %v319_v17 = vmul.f32 %v541_v15, %v305_v4 }
 0x33f   :  { %v328_v19 = vmul.f32 %v362_v16, %v319_v17 }
 0x340   :  { %v543_v20 = vpop.eup %542 }
 0x341   :  { %v320_v21 = vmul.f32 %v543_v20, %v306_v7  ;;  %v337_v22 = vadd.f32 %v363_v18, %v328_v19 }
 0x343   :  { %v329_v23 = vmul.f32 %v362_v16, %v320_v21  ;;  %339 = vst [vmem:[#allocation9] sm:$0xff] %v337_v22 }
 0x345   :  { %v338_v24 = vadd.f32 %v363_v18, %v329_v23 }
 0x347   :  { %340 = vst [vmem:[#allocation9 + $0x8] sm:$0xff] %v338_v24 }
 0x348   :  { %621 = shalt.err (!%p618_p0)
}
 0x349   :  { %s622_s28 = scalar_lea.hbm %s779_s8, 256 }
 0x34a   :  { %p623_p1 = scmp.ne.s32.totalorder %s779_s8, %s622_s28  ;;  %p626_p2 = scmp.lt.u32.totalorder %s622_s28, %s779_s8 }
 0x34c   :  { %p628_p3 = pnand %p626_p2, %p623_p1 }
 0x34e   :  { %631 = shalt.err (!%p628_p3)
}
 0x34f   :  { %352 = dma.vmem_to_hbm [thread:$0]  %s347_s29, 256, %s779_s8, [#allocation5], %s640_s17, %s640_s17, %s641_s18  }
 0x350   :  { %636 = dma.done.wait [#allocation5], 256  }
 0x351   :  { %637 = vsyncadd [#allocation5], 4294967040 }
 0x352   :  { %356 = vsyncpa [#allocation4], 1 }
 0x353   :  { %357 = vsyncpa [#allocation7], 1 }
 0x354   :  { %358 = vsyncpa [#allocation5], 1 }

</bundles_post_ra>
